<compile_context>
chip_gen: v7x
topology: tpu7x:2x2x1
jax: 0.10.0
libtpu: 0.0.40
codegen_flags: <defaults>
</compile_context>

<pallas_src>
import jax
import jax.numpy as jnp
from jax.experimental import pallas as pl
from jax.experimental.pallas import tpu as pltpu


def _mlp_kernel(params_ref, x_ref, o_ref):
    # params_ref: SMEM (4,) f32 = [w1, b1, w2, b2] (scalars since features == 1)
    w1 = params_ref[0]
    b1 = params_ref[1]
    w2 = params_ref[2]
    b2 = params_ref[3]
    x = x_ref[...].astype(jnp.float32)      # (block_m, C) lane-dense tile
    h = jnp.maximum(x * w1 + b1, 0.0)       # Linear(1,1) + ReLU
    o_ref[...] = (h * w2 + b2).astype(o_ref.dtype)  # Linear(1,1)


def _round_up(v, m):
    return ((v + m - 1) // m) * m


def _scalar(p):
    # PyTorch Linear(1,1) params are shaped (1,1)/(1,); squeeze to 0-d f32.
    return jnp.asarray(p, jnp.float32).reshape(())


def mlp_forward(x, w1, b1, w2, b2, *, lane_width=512, tile_rows=1024,
                donate_input=False):
    """Forward pass of MLP(Linear(1,1) -> ReLU -> Linear(1,1)).

    x: any shape (normally (N, 1)).  The math is elementwise per scalar, so
    the wrapper views the flat prefix (length multiple of `lane_width`) as a
    lane-dense (m, lane_width) slab and streams it through a tiled Pallas
    kernel; the tiny remainder (< lane_width elements) is computed in JAX.
    """
    assert lane_width % 128 == 0, "lane_width must be a multiple of 128 lanes"

    orig_shape = x.shape
    if not jnp.issubdtype(x.dtype, jnp.floating):
        x = x.astype(jnp.float32)
    io_dtype = x.dtype
    itemsize = jnp.dtype(io_dtype).itemsize
    # Sublane multiple for this dtype (8 for f32, 16 for bf16, 32 for fp8/int8).
    sub = max(8, 32 // itemsize)
    tile_rows = _round_up(tile_rows, sub)

    flat = jnp.ravel(x)
    n = flat.shape[0]

    params = jnp.stack([_scalar(w1), _scalar(b1), _scalar(w2), _scalar(b2)])

    c = lane_width
    if n < c:
        c = 128  # tiny inputs: keep the kernel path with the minimum lane width
    n_main = (n // c) * c
    n_tail = n - n_main

    parts = []
    if n_main:
        m = n_main // c
        block_m = min(tile_rows, _round_up(m, sub))
        # Keep >= 2 grid steps when there is enough work so dual-TC parts
        # (v7x) can split the stream; single-TC chips just pay one extra
        # ~0.35 us pipeline step.
        if m > sub and pl.cdiv(m, block_m) < 2:
            block_m = _round_up(pl.cdiv(m, 2), sub)
        grid = (pl.cdiv(m, block_m),)  # ragged last row-block is masked by Pallas

        x2d = flat[:n_main].reshape(m, c)  # zero-pad-free, lane-dense slab

        call_kwargs = {}
        if donate_input:
            # Only safe when the caller does not need x afterwards; otherwise
            # XLA inserts a defensive copy and this becomes a loss.
            call_kwargs["input_output_aliases"] = {1: 0}

        out2d = pl.pallas_call(
            _mlp_kernel,
            out_shape=jax.ShapeDtypeStruct((m, c), io_dtype),
            grid_spec=pl.GridSpec(
                grid=grid,
                in_specs=[
                    pl.BlockSpec(memory_space=pltpu.SMEM),         # params (4,)
                    pl.BlockSpec((block_m, c), lambda i: (i, 0)),  # x tile
                ],
                out_specs=pl.BlockSpec((block_m, c), lambda i: (i, 0)),
            ),
            compiler_params=pltpu.CompilerParams(
                dimension_semantics=("parallel",),
                vmem_limit_bytes=32 * 1024 * 1024,
            ),
            cost_estimate=pl.CostEstimate(
                flops=5 * m * c,
                transcendentals=0,
                bytes_accessed=2 * m * c * itemsize + 16,
            ),
            **call_kwargs,
        )(params, x2d)
        parts.append(out2d.reshape(-1))

    if n_tail:
        # < lane_width leftover elements: plain JAX, avoids padding the slab.
        tail = flat[n_main:].astype(jnp.float32)
        h = jnp.maximum(tail * params[0] + params[1], 0.0)
        parts.append((h * params[2] + params[3]).astype(io_dtype))

    out_flat = parts[0] if len(parts) == 1 else jnp.concatenate(parts)
    return out_flat.reshape(orig_shape)


if __name__ == "__main__":
    key = jax.random.PRNGKey(0)
    kx, k1, k2, k3, k4 = jax.random.split(key, 5)

    # PyTorch Linear(1,1) init is U(-1/sqrt(fan_in), 1/sqrt(fan_in)) = U(-1, 1),
    # with weight shape (1,1) and bias shape (1,).
    w1 = jax.random.uniform(k1, (1, 1), minval=-1.0, maxval=1.0)
    b1 = jax.random.uniform(k2, (1,), minval=-1.0, maxval=1.0)
    w2 = jax.random.uniform(k3, (1, 1), minval=-1.0, maxval=1.0)
    b2 = jax.random.uniform(k4, (1,), minval=-1.0, maxval=1.0)

    w1s, b1s, w2s, b2s = (jnp.reshape(p, ()) for p in (w1, b1, w2, b2))

    def ref_fn(x):
        return jnp.maximum(x * w1s + b1s, 0.0) * w2s + b2s

    # 1) Exact-fit lane-dense slab: (1024, 1) -> (8, 128), single grid step,
    #    no tail and zero padding.
    x1 = jax.random.normal(kx, (1024, 1), dtype=jnp.float32)
    o1 = mlp_forward(x1, w1, b1, w2, b2, lane_width=128, tile_rows=8)
    jax.block_until_ready(o1)
    assert o1.shape == x1.shape
    assert jnp.allclose(o1, ref_fn(x1), atol=1e-6), "exact-fit mismatch"

    # 2) Ragged batch: (3000, 1) -> 23 main rows of 128 (grid=3, ragged last
    #    row-block) + 56-element JAX tail.  No full-array pad/slice copies.
    x2 = jax.random.normal(kx, (3000, 1), dtype=jnp.float32)
    o2 = mlp_forward(x2, w1, b1, w2, b2, lane_width=128, tile_rows=8)
    jax.block_until_ready(o2)
    assert o2.shape == x2.shape
    assert jnp.allclose(o2, ref_fn(x2), atol=1e-6), "ragged-grid mismatch"

    # 3) Default tiling path (lane_width=512, tile_rows=1024): split into
    #    >= 2 grid steps, ragged last block, small JAX tail.
    x3 = jax.random.normal(kx, (70000, 1), dtype=jnp.float32)
    o3 = mlp_forward(x3, w1, b1, w2, b2)
    jax.block_until_ready(o3)
    assert o3.shape == x3.shape
    assert jnp.allclose(o3, ref_fn(x3), atol=1e-6), "default-tile mismatch"

    print("KERNEL_OK")
</pallas_src>

<mosaic_0001>
module attributes {stable_mosaic.version = 11 : i64} {
  func.func @_mlp_kernel(%arg0: i32, %arg1: memref<4xf32, #tpu.memory_space<smem>>, %arg2: memref<8x128xf32, #tpu.memory_space<vmem>>, %arg3: memref<8x128xf32, #tpu.memory_space<vmem>>) attributes {dimension_semantics = [#tpu.dimension_semantics<parallel>], iteration_bounds = array<i64: 1>, scalar_prefetch = 0 : i64, scratch_operands = 0 : i64, tpu.core_type = #tpu.core_type<tc>, window_params = [{transform_indices = @transform_0, window_bounds = array<i64: 4>}, {transform_indices = @transform_1, window_bounds = array<i64: 8, 128>}, {transform_indices = @transform_2, window_bounds = array<i64: 8, 128>}]} {
    %c0 = arith.constant 0 : index
    %0 = memref.load %arg1[%c0] : memref<4xf32, #tpu.memory_space<smem>>
    %c1 = arith.constant 1 : index
    %1 = memref.load %arg1[%c1] : memref<4xf32, #tpu.memory_space<smem>>
    %c2 = arith.constant 2 : index
    %2 = memref.load %arg1[%c2] : memref<4xf32, #tpu.memory_space<smem>>
    %c3 = arith.constant 3 : index
    %3 = memref.load %arg1[%c3] : memref<4xf32, #tpu.memory_space<smem>>
    %c0_0 = arith.constant 0 : index
    %c0_1 = arith.constant 0 : index
    %4 = vector.load %arg2[%c0_0, %c0_1] : memref<8x128xf32, #tpu.memory_space<vmem>>, vector<8x128xf32>
    %5 = vector.broadcast %0 : f32 to vector<8x128xf32>
    %6 = arith.mulf %4, %5 : vector<8x128xf32>
    %7 = vector.broadcast %1 : f32 to vector<8x128xf32>
    %8 = arith.addf %6, %7 : vector<8x128xf32>
    %cst = arith.constant 0.000000e+00 : f32
    %9 = vector.broadcast %cst : f32 to vector<8x128xf32>
    %10 = arith.maximumf %8, %9 : vector<8x128xf32>
    %11 = vector.broadcast %2 : f32 to vector<8x128xf32>
    %12 = arith.mulf %10, %11 : vector<8x128xf32>
    %13 = vector.broadcast %3 : f32 to vector<8x128xf32>
    %14 = arith.addf %12, %13 : vector<8x128xf32>
    %c0_2 = arith.constant 0 : index
    %c0_3 = arith.constant 0 : index
    %15 = vector.load %arg3[%c0_2, %c0_3] : memref<8x128xf32, #tpu.memory_space<vmem>>, vector<8x128xf32>
    tpu.vector_store %arg3[%c0_2, %c0_3], %14 {strides = array<i32>} : memref<8x128xf32, #tpu.memory_space<vmem>>, vector<8x128xf32>,
    return
  }
  func.func @transform_0(%arg0: i32) -> i32 {
    %c0_i32 = arith.constant 0 : i32
    %c0_i32_0 = arith.constant 0 : i32
    return %c0_i32 : i32
  }
  func.func @transform_1(%arg0: i32) -> (i32, i32) {
    %c0_i32 = arith.constant 0 : i32
    %c0_i32_0 = arith.constant 0 : i32
    return %arg0, %c0_i32 : i32, i32
  }
  func.func @transform_2(%arg0: i32) -> (i32, i32) {
    %c0_i32 = arith.constant 0 : i32
    %c0_i32_0 = arith.constant 0 : i32
    return %arg0, %c0_i32 : i32, i32
  }
}

</mosaic_0001>

<bundles_post_ra>
// kernel: tpu_custom_call.1
= control target key start
LH: loop header
LB: loop body
LE: loop exit
PB: predicated region body
PF: predicated region fallthrough
CT: control target
= control target key end

     0   :  { %7 = vsyncpa [#allocation5], 0  ;;  %s186_s0 = inlined_call_operand.hbm [shape: f32[4], index: 0, kind: input, shape index: {}]   ;;  %s187_s1 = inlined_call_operand.hbm [shape: f32[8,128], index: 1, kind: input, shape index: {}]   ;;  %s188_s2 = inlined_call_operand.hbm [shape: f32[8,128], index: 2, kind: output, shape index: {}]  }
   0x1   :  { %8 = vsyncpa [#allocation3], 0 }
   0x2   :  { %9 = vsyncpa [#allocation4], 0  ;;  %s72_s11 = scalar_lea.hbm %s186_s0, 16 }
   0x3   :  { %p73_p0 = scmp.ne.s32.totalorder %s186_s0, %s72_s11  ;;  %p76_p1 = scmp.lt.u32.totalorder %s72_s11, %s186_s0 }
   0x5   :  { %p78_p2 = pnand %p76_p1, %p73_p0 }
   0x7   :  { %81 = shalt.err (!%p78_p2)
}
   0x8   :  { %s132_s16 = smov [#allocation2]   ;;  %s133_s19 = smov [#allocation6]  }
   0x9   :  { %17 = dma.hbm_to_smem %s186_s0, 16, %s132_s16, [#allocation5]  }
   0xa   :  { %s24_s20 = sshll.u32 %s133_s19, 4  ;;  %s82_s23 = scalar_lea.hbm %s187_s1, 128  ;;  %s25_s20 = int_to_ptr.vmem [resolvable:$true] %s24_s20 }
   0xb   :  { %p83_p3 = scmp.ne.s32.totalorder %s187_s1, %s82_s23  ;;  %p86_p4 = scmp.lt.u32.totalorder %s82_s23, %s187_s1 }
   0xd   :  { %p88_p5 = pnand %p86_p4, %p83_p3 }
   0xf   :  { %91 = shalt.err (!%p88_p5)
}
  0x10   :  { %s92_s28 = scalar_lea.vmem %s25_s20, 128  ;;  %p97_p7 = scmp.lt.s32.totalorder %s25_s20, %s25_s20 }
  0x11   :  { %p93_p6 = scmp.ne.s32.totalorder %s25_s20, %s92_s28  ;;  %p98_p8 = scmp.lt.s32.totalorder %s92_s28, %s92_s28 }
  0x13   :  { %p99_p9 = por %p98_p8, %p97_p7 }
  0x15   :  { %p100_p10 = pnand %p99_p9, %p93_p6 }
  0x17   :  { %103 = shalt.err (!%p100_p10)
}
  0x18   :  { %27 = dma.hbm_to_vmem [thread:$0]  %s187_s1, 128, %s25_s20, [#allocation3]  }
  0x19   :  { %126 = dma.done.wait [#allocation5], 16  }
  0x1a   :  { %127 = vsyncadd [#allocation5], 4294967280 }
  0x1b   :  { %128 = dma.done.wait [#allocation3], 128  }
  0x1c   :  { %129 = vsyncadd [#allocation3], 4294967168 }
  0x1d   :  { %34 = sfence }
  0x1e   :  { %s35_s30 = sld [smem:[#allocation2]]  ;;  %s66_s3 = sld [smem:[#allocation2 + $0x1]]  ;;  %v39_v0 = vld [vmem:[#allocation6] sm:$0xff] }
  0x1f   :  { %s67_s4 = sld [smem:[#allocation2 + $0x2]]  ;;  %s68_s5 = sld [smem:[#allocation2 + $0x3]] }
  0x20   :  { %s134_s6 = smov [#allocation7]  }
  0x21   :  { %s56_s7 = sshll.u32 %s134_s6, 4  ;;  %s57_s7 = int_to_ptr.vmem [resolvable:$true] %s56_s7 }
  0x22   :  { %s104_s1 = scalar_lea.vmem %s57_s7, 128  ;;  %p109_p12 = scmp.lt.s32.totalorder %s57_s7, %s57_s7 }
  0x23   :  { %p105_p11 = scmp.ne.s32.totalorder %s57_s7, %s104_s1  ;;  %p110_p13 = scmp.lt.s32.totalorder %s104_s1, %s104_s1 }
  0x24   :  { %v40_v1 = vstv %s35_s30  ;;  %v42_v2 = vstv %s66_s3 }
  0x25   :  { %v41_v3 = vmul.f32 %v40_v1, %v39_v0  ;;  %v45_v5 = vstv %s67_s4  ;;  %v47_v7 = vstv %s68_s5  ;;  %p111_p0 = por %p110_p13, %p109_p12 }
  0x27   :  { %v43_v4 = vadd.f32 %v42_v2, %v41_v3  ;;  %p112_p1 = pnand %p111_p0, %p105_p11 }
  0x29   :  { %v44_v6 = vmax.f32 %v43_v4, 0.0 }
  0x2b   :  { %v46_v8 = vmul.f32 %v45_v5, %v44_v6 }
  0x2d   :  { %v48_v9 = vadd.f32 %v47_v7, %v46_v8 }
  0x2f   :  { %49 = vst [vmem:[#allocation7] sm:$0xff] %v48_v9 }
  0x30   :  { %115 = shalt.err (!%p112_p1)
}
  0x31   :  { %s116_s10 = scalar_lea.hbm %s188_s2, 128 }
  0x32   :  { %p117_p2 = scmp.ne.s32.totalorder %s188_s2, %s116_s10  ;;  %p120_p3 = scmp.lt.u32.totalorder %s116_s10, %s188_s2 }
  0x34   :  { %p122_p4 = pnand %p120_p3, %p117_p2 }
  0x36   :  { %125 = shalt.err (!%p122_p4)
}
  0x37   :  { %59 = dma.vmem_to_hbm [thread:$0]  %s57_s7, 128, %s188_s2, [#allocation4]  }
  0x38   :  { %130 = dma.done.wait [#allocation4], 128  }
  0x39   :  { %131 = vsyncadd [#allocation4], 4294967168 }
  0x3a   :  { %63 = vsyncpa [#allocation3], 1 }
  0x3b   :  { %64 = vsyncpa [#allocation4], 1 }
  0x3c   :  { %65 = vsyncpa [#allocation5], 1 }

</bundles_post_ra>
